<compile_context>
chip_gen: v6e
topology: v6e:2x2x1
jax: 0.10.0
libtpu: 0.0.40
codegen_flags: <defaults>
</compile_context>

<pallas_src>
import jax
import jax.numpy as jnp
from jax import lax
from jax.experimental import pallas as pl
from jax.experimental.pallas import tpu as pltpu

BN_EPS = 1e-5
INV_SQRT2 = 0.7071067811865476


# --------------------------------------------------------------------------
# In-kernel helpers (trace-time inlined)
# --------------------------------------------------------------------------
def _bn_normalize(X):
    """BatchNorm1d training-mode per time step: batch mean, biased batch var."""
    mean = jnp.mean(X, axis=0, keepdims=True)                 # (1, TT, D)
    var = jnp.mean((X - mean) ** 2, axis=0, keepdims=True)    # (1, TT, D)
    return (X - mean) * lax.rsqrt(var + BN_EPS)


def _gelu(h):
    """Exact erf-based GELU, matching torch.nn.GELU() default."""
    return 0.5 * h * (1.0 + lax.erf(h * INV_SQRT2))


def _softplus(z):
    return jnp.maximum(z, 0.0) + jnp.log1p(jnp.exp(-jnp.abs(z)))


# --------------------------------------------------------------------------
# Kernels
# --------------------------------------------------------------------------
def _prior_kernel_wide(x_ref, w1_ref, b1_ref, w2m_ref, w2s_ref, b2_ref, out_ref):
    """Standard orientation, used when 2Z >= 128 (output already lane-dense).

    x_ref:   (B, TILE_T, D)
    w1_ref:  (D, 2H)   (gamma folded, mu||std concat)   b1_ref: (1, 2H)
    w2m_ref: (H, Z)    w2s_ref: (H, Z)  (zero block of the old block-diag dropped)
    b2_ref:  (1, 2Z)
    out_ref: (B, TILE_T, 2Z)
    """
    B, TT, D = x_ref.shape
    H = w2m_ref.shape[0]
    ZZ = out_ref.shape[-1]

    X = x_ref[...].astype(jnp.float32)
    xn = _bn_normalize(X).reshape(B * TT, D)

    h = jnp.dot(xn.astype(w1_ref.dtype), w1_ref[...],
                preferred_element_type=jnp.float32) + b1_ref[...]
    h = _gelu(h).astype(w2m_ref.dtype)

    z_mu = jnp.dot(h[:, :H], w2m_ref[...], preferred_element_type=jnp.float32)
    z_sd = jnp.dot(h[:, H:], w2s_ref[...], preferred_element_type=jnp.float32)
    z = jnp.concatenate([z_mu, z_sd], axis=1) + b2_ref[...]
    z = _softplus(z)

    out_ref[...] = z.reshape(B, TT, ZZ).astype(out_ref.dtype)


def _prior_kernel_tall(x_ref, w1t_ref, b1t_ref, w2t_ref, b2t_ref, out_ref):
    """Transposed orientation, used when 2Z < 128.

    Rows (B*TILE_T) live on the lane axis -> GELU/Softplus vregs and the
    output store are lane-dense regardless of how small D / H / Z are.

    x_ref:   (B, TILE_T, D)
    w1t_ref: (2H, D)    b1t_ref: (2H, 1)
    w2t_ref: (2Z, 2H)   (block-diagonal mu/std, transposed)   b2t_ref: (2Z, 1)
    out_ref: (1, 2Z, B*TILE_T)
    """
    B, TT, D = x_ref.shape
    ZZ = out_ref.shape[1]
    rows = B * TT

    X = x_ref[...].astype(jnp.float32)
    xn = _bn_normalize(X).reshape(rows, D)
    xnT = jnp.transpose(xn)                                   # (D, rows) — XLU

    h = jnp.dot(w1t_ref[...], xnT.astype(w1t_ref.dtype),
                preferred_element_type=jnp.float32) + b1t_ref[...]   # (2H, rows)
    h = _gelu(h)

    z = jnp.dot(w2t_ref[...], h.astype(w2t_ref.dtype),
                preferred_element_type=jnp.float32) + b2t_ref[...]   # (2Z, rows)
    z = _softplus(z)

    out_ref[...] = z.reshape(1, ZZ, rows).astype(out_ref.dtype)


# --------------------------------------------------------------------------
# Wrapper
# --------------------------------------------------------------------------
def _fold_bn_into_linear(g, be, w1, b1):
    """(xn*g + be) @ W1 + b1 == xn @ (diag(g) @ W1) + (be @ W1 + b1)."""
    w = g.reshape(-1, 1) * w1
    b = be @ w1 + b1
    return w, b


def _choose_tile_t(T, B, target_rows=512):
    """tile_t such that B*tile_t ~ target_rows; multiple of 8 or == T, never < 8
    (rows are rounded UP above target rather than dropping below 8)."""
    if B * T <= target_rows:
        return T
    t = max(1, target_rows // B)
    t = max(8, (t // 8) * 8)
    return min(t, T)


def autoencoder_forward(x, params, *, tile_t=None,
                        matmul_dtype=jnp.bfloat16, io_dtype=None,
                        lane_dense_out=None):
    """x: (B, T, input_size) float32. Returns (history_z, (mu, std)).

    history_z: (B, T, 2*z_size), matching the PyTorch forward.
    mu, std:   (B, T, z_size) — parameters of the Normal() priors the PyTorch
               forward returns as distribution objects.

    matmul_dtype (default bfloat16): dtype of BOTH the weights and the
      normalized activations fed to the MXU (f32 accumulation).  Use
      jnp.float32 for bit-accurate f32 matmuls.
    io_dtype: if jnp.bfloat16, x is cast before the kernel and history_z is
      emitted in bf16 (halves HBM traffic); BN/GELU/Softplus stay f32 inside.
    """
    B, T, D = x.shape
    H = params["w1_mu"].shape[1]
    Z = params["w2_mu"].shape[1]
    if lane_dense_out is None:
        lane_dense_out = (2 * Z < 128)

    # ---- tile_t selection, (8,128)-safe, with time padding if needed --------
    if tile_t is None:
        tile_t = _choose_tile_t(T, B)
    tile_t = int(min(tile_t, T))
    if tile_t < T and tile_t % 8 != 0:
        tile_t = min(T, ((tile_t + 7) // 8) * 8)
    T_pad = -(-T // tile_t) * tile_t
    G = T_pad // tile_t
    rows = B * tile_t

    # ---- dtypes / padding ----------------------------------------------------
    out_dtype = jnp.float32 if io_dtype is None else io_dtype
    x_in = x if io_dtype is None else x.astype(io_dtype)
    if T_pad != T:
        x_in = jnp.pad(x_in, ((0, 0), (0, T_pad - T), (0, 0)))

    # ---- fold BN gamma/beta into Linear1, pack both branches ------------------
    w1m, b1m = _fold_bn_into_linear(params["g_mu"], params["be_mu"],
                                    params["w1_mu"], params["b1_mu"])
    w1s, b1s = _fold_bn_into_linear(params["g_sd"], params["be_sd"],
                                    params["w1_sd"], params["b1_sd"])
    w1f = jnp.concatenate([w1m, w1s], axis=1).astype(matmul_dtype)      # (D, 2H)
    b1f = jnp.concatenate([b1m, b1s], axis=1).astype(jnp.float32)       # (1, 2H)
    b2f = jnp.concatenate([params["b2_mu"], params["b2_sd"]],
                          axis=1).astype(jnp.float32)                   # (1, 2Z)

    # ---- VMEM budget + cost estimate ------------------------------------------
    bpe_io = jnp.dtype(out_dtype).itemsize
    bpe_w = jnp.dtype(matmul_dtype).itemsize
    weight_bytes = (D * 2 * H + 2 * H * 2 * Z) * bpe_w + (2 * H + 2 * Z) * 4
    block_bytes = rows * D * bpe_io + rows * 2 * Z * bpe_io
    interm_bytes = 2 * rows * (D + 2 * H + 2 * Z) * 4
    vmem_needed = 2 * block_bytes + 2 * weight_bytes + interm_bytes
    vmem_limit = int(min(2 * vmem_needed, 64 * 2**20))
    vmem_limit = max(vmem_limit, vmem_needed + (2 << 20), 32 * 2**20)
    vmem_limit = int(min(vmem_limit, 128 * 2**20))

    cost = pl.CostEstimate(
        flops=int(2 * B * T * (D * 2 * H + H * 2 * Z)),
        transcendentals=int(B * T * (2 * H + 4 * Z)),
        bytes_accessed=int(B * T * (D + 2 * Z) * bpe_io + weight_bytes),
    )
    cparams = pltpu.CompilerParams(
        dimension_semantics=("parallel",),   # time tiles are independent
        vmem_limit_bytes=vmem_limit)

    const = lambda i: (0, 0)   # weights: constant block -> DMA'd only once

    if lane_dense_out:
        # ---- transposed path (2Z < 128): lane-dense h / z / stores ----------
        w1t = jnp.transpose(w1f)                                  # (2H, D)
        b1t = jnp.transpose(b1f)                                  # (2H, 1)
        w2blk = jnp.zeros((2 * Z, 2 * H), jnp.float32)
        w2blk = (w2blk.at[:Z, :H].set(jnp.transpose(params["w2_mu"]))
                       .at[Z:, H:].set(jnp.transpose(params["w2_sd"])))
        w2t = w2blk.astype(matmul_dtype)                          # (2Z, 2H)
        b2t = jnp.transpose(b2f)                                  # (2Z, 1)

        out_flat = pl.pallas_call(
            _prior_kernel_tall,
            out_shape=jax.ShapeDtypeStruct((G, 2 * Z, rows), out_dtype),
            grid_spec=pltpu.PrefetchScalarGridSpec(
                num_scalar_prefetch=0,
                grid=(G,),
                in_specs=[
                    pl.BlockSpec((B, tile_t, D), lambda i: (0, i, 0)),
                    pl.BlockSpec((2 * H, D), const),
                    pl.BlockSpec((2 * H, 1), const),
                    pl.BlockSpec((2 * Z, 2 * H), const),
                    pl.BlockSpec((2 * Z, 1), const),
                ],
                out_specs=pl.BlockSpec((1, 2 * Z, rows), lambda i: (i, 0, 0)),
            ),
            compiler_params=cparams,
            cost_estimate=cost,
        )(x_in, w1t, b1t, w2t, b2t)

        # (G, 2Z, B*tile_t) -> (B, T, 2Z): layout plumbing in the wrapper.
        hz = out_flat.reshape(G, 2 * Z, B, tile_t)
        hz = jnp.transpose(hz, (2, 0, 3, 1)).reshape(B, T_pad, 2 * Z)[:, :T, :]
    else:
        # ---- standard path (2Z >= 128): output layout already lane-dense ----
        w2m = params["w2_mu"].astype(matmul_dtype)                # (H, Z)
        w2s = params["w2_sd"].astype(matmul_dtype)                # (H, Z)

        out = pl.pallas_call(
            _prior_kernel_wide,
            out_shape=jax.ShapeDtypeStruct((B, T_pad, 2 * Z), out_dtype),
            grid_spec=pltpu.PrefetchScalarGridSpec(
                num_scalar_prefetch=0,
                grid=(G,),
                in_specs=[
                    pl.BlockSpec((B, tile_t, D), lambda i: (0, i, 0)),
                    pl.BlockSpec((D, 2 * H), const),
                    pl.BlockSpec((1, 2 * H), const),
                    pl.BlockSpec((H, Z), const),
                    pl.BlockSpec((H, Z), const),
                    pl.BlockSpec((1, 2 * Z), const),
                ],
                out_specs=pl.BlockSpec((B, tile_t, 2 * Z), lambda i: (0, i, 0)),
            ),
            compiler_params=cparams,
            cost_estimate=cost,
        )(x_in, w1f, b1f, w2m, w2s, b2f)
        hz = out[:, :T, :]

    mu = hz[:, :, :Z]
    std = hz[:, :, Z:]
    return hz, (mu, std)


# --------------------------------------------------------------------------
# Params / reference
# --------------------------------------------------------------------------
def init_params(key, input_size, hidden_size, z_size):
    """Parameter init mirroring PyTorch default shapes (weights stored (in,out))."""
    ks = jax.random.split(key, 8)

    def lin(kw, kb, fan_in, fan_out):
        bound = 1.0 / jnp.sqrt(float(fan_in))
        w = jax.random.uniform(kw, (fan_in, fan_out), jnp.float32,
                               minval=-bound, maxval=bound)
        b = jax.random.uniform(kb, (1, fan_out), jnp.float32,
                               minval=-bound, maxval=bound)
        return w, b

    w1_mu, b1_mu = lin(ks[0], ks[1], input_size, hidden_size)
    w2_mu, b2_mu = lin(ks[2], ks[3], hidden_size, z_size)
    w1_sd, b1_sd = lin(ks[4], ks[5], input_size, hidden_size)
    w2_sd, b2_sd = lin(ks[6], ks[7], hidden_size, z_size)

    return {
        "g_mu": jnp.ones((1, input_size), jnp.float32),
        "be_mu": jnp.zeros((1, input_size), jnp.float32),
        "w1_mu": w1_mu, "b1_mu": b1_mu, "w2_mu": w2_mu, "b2_mu": b2_mu,
        "g_sd": jnp.ones((1, input_size), jnp.float32),
        "be_sd": jnp.zeros((1, input_size), jnp.float32),
        "w1_sd": w1_sd, "b1_sd": b1_sd, "w2_sd": w2_sd, "b2_sd": b2_sd,
    }


def _reference_forward(x, params):
    """Pure-JAX per-time-step reference mirroring the PyTorch forward exactly."""
    def branch(X, g, be, w1, b1, w2, b2):
        mean = jnp.mean(X, axis=0, keepdims=True)
        var = jnp.mean((X - mean) ** 2, axis=0, keepdims=True)
        xn = (X - mean) / jnp.sqrt(var + BN_EPS) * g + be
        h = xn @ w1 + b1
        h = 0.5 * h * (1.0 + lax.erf(h * INV_SQRT2))
        z = h @ w2 + b2
        return jax.nn.softplus(z)

    outs = []
    for t in range(x.shape[1]):
        X = x[:, t, :]
        mu = branch(X, params["g_mu"], params["be_mu"], params["w1_mu"],
                    params["b1_mu"], params["w2_mu"], params["b2_mu"])
        sd = branch(X, params["g_sd"], params["be_sd"], params["w1_sd"],
                    params["b1_sd"], params["w2_sd"], params["b2_sd"])
        outs.append(jnp.concatenate([mu, sd], axis=1))
    return jnp.transpose(jnp.stack(outs), (1, 0, 2))


# --------------------------------------------------------------------------
# Demo / self-test
# --------------------------------------------------------------------------
if __name__ == "__main__":
    B, T, D, H = 8, 32, 16, 32
    key = jax.random.PRNGKey(0)
    keys = jax.random.split(key, 9)

    def make_case(kx, kp, kg, T_case, Z_case):
        x = jax.random.normal(kx, (B, T_case, D), jnp.float32)
        params = init_params(kp, D, H, Z_case)
        kg1, kb1, kg2, kb2 = jax.random.split(kg, 4)
        # Non-trivial BN affine params so the gamma/beta folding is exercised.
        params["g_mu"] = 0.5 + jax.random.uniform(kg1, (1, D), jnp.float32)
        params["be_mu"] = 0.2 * jax.random.normal(kb1, (1, D), jnp.float32)
        params["g_sd"] = 0.5 + jax.random.uniform(kg2, (1, D), jnp.float32)
        params["be_sd"] = 0.2 * jax.random.normal(kb2, (1, D), jnp.float32)
        return x, params

    def check(hz, ref, atol, rtol, name):
        hz = jax.block_until_ready(hz)
        hz32 = hz.astype(jnp.float32)
        err = float(jnp.max(jnp.abs(hz32 - ref)))
        assert jnp.allclose(hz32, ref, atol=atol, rtol=rtol), (
            "%s: max abs err = %e" % (name, err))

    # Case 1: small z (lane-dense transposed path), exact f32 matmuls.
    Z = 8
    x1, p1 = make_case(keys[0], keys[1], keys[2], T, Z)
    ref1 = _reference_forward(x1, p1)
    hz1, (mu1, std1) = autoencoder_forward(x1, p1, matmul_dtype=jnp.float32)
    assert hz1.shape == (B, T, 2 * Z)
    assert mu1.shape == (B, T, Z) and std1.shape == (B, T, Z)
    check(hz1, ref1, 5e-5, 5e-5, "tall/f32")

    # Case 2: default bf16 matmul path (all generations), same data.
    hz2, _ = autoencoder_forward(x1, p1)
    check(hz2, ref1, 1.5e-1, 1.5e-1, "tall/bf16-matmul")

    # Case 3: bf16 activation I/O (x + history_z in bf16, math f32 inside).
    hz3, _ = autoencoder_forward(x1, p1, io_dtype=jnp.bfloat16)
    check(hz3, ref1, 2e-1, 2e-1, "tall/bf16-io")

    # Case 4: multi-step grid with time padding (T=20, tile_t=8 -> pad to 24).
    x4, p4 = make_case(keys[3], keys[4], keys[5], 20, Z)
    ref4 = _reference_forward(x4, p4)
    hz4, _ = autoencoder_forward(x4, p4, tile_t=8, matmul_dtype=jnp.float32)
    assert hz4.shape == (B, 20, 2 * Z)
    check(hz4, ref4, 5e-5, 5e-5, "tall/pad-grid")

    # Case 5: wide path (2Z >= 128), split second-layer weights, exact f32.
    Z5 = 64
    x5, p5 = make_case(keys[6], keys[7], keys[8], T, Z5)
    ref5 = _reference_forward(x5, p5)
    hz5, _ = autoencoder_forward(x5, p5, matmul_dtype=jnp.float32)
    assert hz5.shape == (B, T, 2 * Z5)
    check(hz5, ref5, 5e-5, 5e-5, "wide/f32")

    print("KERNEL_OK")
</pallas_src>

<mosaic_0001>
module attributes {stable_mosaic.version = 11 : i64} {
  func.func @_prior_kernel_tall(%arg0: i32, %arg1: memref<8x32x16xf32, #tpu.memory_space<vmem>>, %arg2: memref<64x16xf32, #tpu.memory_space<vmem>>, %arg3: memref<64x1xf32, #tpu.memory_space<vmem>>, %arg4: memref<16x64xf32, #tpu.memory_space<vmem>>, %arg5: memref<16x1xf32, #tpu.memory_space<vmem>>, %arg6: memref<1x16x256xf32, #tpu.memory_space<vmem>>) attributes {dimension_semantics = [#tpu.dimension_semantics<parallel>], iteration_bounds = array<i64: 1>, scalar_prefetch = 0 : i64, scratch_operands = 0 : i64, tpu.core_type = #tpu.core_type<tc>, window_params = [{transform_indices = @transform_0, window_bounds = array<i64: 8, 32, 16>}, {pipeline_mode = #tpu.pipeline_mode<synchronous>, transform_indices = @transform_1, window_bounds = array<i64: 64, 16>}, {pipeline_mode = #tpu.pipeline_mode<synchronous>, transform_indices = @transform_2, window_bounds = array<i64: 64, 1>}, {pipeline_mode = #tpu.pipeline_mode<synchronous>, transform_indices = @transform_3, window_bounds = array<i64: 16, 64>}, {pipeline_mode = #tpu.pipeline_mode<synchronous>, transform_indices = @transform_4, window_bounds = array<i64: 16, 1>}, {transform_indices = @transform_5, window_bounds = array<i64: 1, 16, 256>}]} {
    %c0 = arith.constant 0 : index
    %c0_0 = arith.constant 0 : index
    %c0_1 = arith.constant 0 : index
    %0 = vector.load %arg1[%c0, %c0_0, %c0_1] : memref<8x32x16xf32, #tpu.memory_space<vmem>>, vector<8x32x16xf32>
    %cst = arith.constant dense<0.000000e+00> : vector<32x16xf32>
    %1 = vector.multi_reduction <add>, %0, %cst [0] : vector<8x32x16xf32> to vector<32x16xf32>
    %2 = vector.shape_cast %1 : vector<32x16xf32> to vector<1x32x16xf32>
    %cst_2 = arith.constant 8.000000e+00 : f32
    %3 = vector.broadcast %cst_2 : f32 to vector<1x32x16xf32>
    %4 = arith.divf %2, %3 : vector<1x32x16xf32>
    %5 = vector.broadcast %4 : vector<1x32x16xf32> to vector<8x32x16xf32>
    %6 = arith.subf %0, %5 : vector<8x32x16xf32>
    %7 = arith.mulf %6, %6 : vector<8x32x16xf32>
    %cst_3 = arith.constant dense<0.000000e+00> : vector<32x16xf32>
    %8 = vector.multi_reduction <add>, %7, %cst_3 [0] : vector<8x32x16xf32> to vector<32x16xf32>
    %9 = vector.shape_cast %8 : vector<32x16xf32> to vector<1x32x16xf32>
    %cst_4 = arith.constant 8.000000e+00 : f32
    %10 = vector.broadcast %cst_4 : f32 to vector<1x32x16xf32>
    %11 = arith.divf %9, %10 : vector<1x32x16xf32>
    %12 = vector.broadcast %4 : vector<1x32x16xf32> to vector<8x32x16xf32>
    %13 = arith.subf %0, %12 : vector<8x32x16xf32>
    %cst_5 = arith.constant 9.99999974E-6 : f32
    %14 = vector.broadcast %cst_5 : f32 to vector<1x32x16xf32>
    %15 = arith.addf %11, %14 : vector<1x32x16xf32>
    %16 = math.rsqrt %15 : vector<1x32x16xf32>
    %17 = vector.broadcast %16 : vector<1x32x16xf32> to vector<8x32x16xf32>
    %18 = arith.mulf %13, %17 : vector<8x32x16xf32>
    %19 = vector.shape_cast %18 : vector<8x32x16xf32> to vector<256x16xf32>
    %20 = tpu.transpose %19, [1, 0] : vector<256x16xf32> -> vector<16x256xf32>
    %c0_6 = arith.constant 0 : index
    %c0_7 = arith.constant 0 : index
    %21 = vector.load %arg2[%c0_6, %c0_7] : memref<64x16xf32, #tpu.memory_space<vmem>>, vector<64x16xf32>
    %cst_8 = arith.constant dense<0.000000e+00> : vector<64x256xf32>
    %22 = tpu.matmul %21, %20, %cst_8 {dimension_numbers = #tpu.dot_dimension_numbers<[1], [0], [0], [1], [0, 0, 1, 1], [], []>} : vector<64x16xf32>, vector<16x256xf32>, vector<64x256xf32> -> vector<64x256xf32>
    %c0_9 = arith.constant 0 : index
    %c0_10 = arith.constant 0 : index
    %23 = vector.load %arg3[%c0_9, %c0_10] : memref<64x1xf32, #tpu.memory_space<vmem>>, vector<64x1xf32>
    %24 = vector.broadcast %23 : vector<64x1xf32> to vector<64x256xf32>
    %25 = arith.addf %22, %24 : vector<64x256xf32>
    %cst_11 = arith.constant 5.000000e-01 : f32
    %26 = vector.broadcast %cst_11 : f32 to vector<64x256xf32>
    %27 = arith.mulf %26, %25 : vector<64x256xf32>
    %cst_12 = arith.constant 0.707106769 : f32
    %28 = vector.broadcast %cst_12 : f32 to vector<64x256xf32>
    %29 = arith.mulf %25, %28 : vector<64x256xf32>
    %30 = math.erf %29 : vector<64x256xf32>
    %cst_13 = arith.constant 1.000000e+00 : f32
    %31 = vector.broadcast %cst_13 : f32 to vector<64x256xf32>
    %32 = arith.addf %31, %30 : vector<64x256xf32>
    %33 = arith.mulf %27, %32 : vector<64x256xf32>
    %c0_14 = arith.constant 0 : index
    %c0_15 = arith.constant 0 : index
    %34 = vector.load %arg4[%c0_14, %c0_15] : memref<16x64xf32, #tpu.memory_space<vmem>>, vector<16x64xf32>
    %cst_16 = arith.constant dense<0.000000e+00> : vector<16x256xf32>
    %35 = tpu.matmul %34, %33, %cst_16 {dimension_numbers = #tpu.dot_dimension_numbers<[1], [0], [0], [1], [0, 0, 1, 1], [], []>} : vector<16x64xf32>, vector<64x256xf32>, vector<16x256xf32> -> vector<16x256xf32>
    %c0_17 = arith.constant 0 : index
    %c0_18 = arith.constant 0 : index
    %36 = vector.load %arg5[%c0_17, %c0_18] : memref<16x1xf32, #tpu.memory_space<vmem>>, vector<16x1xf32>
    %37 = vector.broadcast %36 : vector<16x1xf32> to vector<16x256xf32>
    %38 = arith.addf %35, %37 : vector<16x256xf32>
    %cst_19 = arith.constant 0.000000e+00 : f32
    %39 = vector.broadcast %cst_19 : f32 to vector<16x256xf32>
    %40 = arith.maximumf %38, %39 : vector<16x256xf32>
    %41 = math.absf %38 : vector<16x256xf32>
    %cst_20 = arith.constant 0.000000e+00 : f32
    %42 = vector.broadcast %cst_20 : f32 to vector<16x256xf32>
    %43 = arith.subf %42, %41 : vector<16x256xf32>
    %44 = math.exp %43 : vector<16x256xf32>
    %45 = math.log1p %44 : vector<16x256xf32>
    %46 = arith.addf %40, %45 : vector<16x256xf32>
    %47 = vector.shape_cast %46 : vector<16x256xf32> to vector<1x16x256xf32>
    %c0_21 = arith.constant 0 : index
    %c0_22 = arith.constant 0 : index
    %c0_23 = arith.constant 0 : index
    %48 = vector.load %arg6[%c0_21, %c0_22, %c0_23] : memref<1x16x256xf32, #tpu.memory_space<vmem>>, vector<1x16x256xf32>
    tpu.vector_store %arg6[%c0_21, %c0_22, %c0_23], %47 {strides = array<i32>} : memref<1x16x256xf32, #tpu.memory_space<vmem>>, vector<1x16x256xf32>,
    return
  }
  func.func @transform_0(%arg0: i32) -> (i32, i32, i32) {
    %c0_i32 = arith.constant 0 : i32
    %c0_i32_0 = arith.constant 0 : i32
    %c0_i32_1 = arith.constant 0 : i32
    return %c0_i32, %arg0, %c0_i32_0 : i32, i32, i32
  }
  func.func @transform_1(%arg0: i32) -> (i32, i32) {
    %c0_i32 = arith.constant 0 : i32
    %c0_i32_0 = arith.constant 0 : i32
    %c0_i32_1 = arith.constant 0 : i32
    return %c0_i32, %c0_i32_0 : i32, i32
  }
  func.func @transform_2(%arg0: i32) -> (i32, i32) {
    %c0_i32 = arith.constant 0 : i32
    %c0_i32_0 = arith.constant 0 : i32
    %c0_i32_1 = arith.constant 0 : i32
    return %c0_i32, %c0_i32_0 : i32, i32
  }
  func.func @transform_3(%arg0: i32) -> (i32, i32) {
    %c0_i32 = arith.constant 0 : i32
    %c0_i32_0 = arith.constant 0 : i32
    %c0_i32_1 = arith.constant 0 : i32
    return %c0_i32, %c0_i32_0 : i32, i32
  }
  func.func @transform_4(%arg0: i32) -> (i32, i32) {
    %c0_i32 = arith.constant 0 : i32
    %c0_i32_0 = arith.constant 0 : i32
    %c0_i32_1 = arith.constant 0 : i32
    return %c0_i32, %c0_i32_0 : i32, i32
  }
  func.func @transform_5(%arg0: i32) -> (i32, i32, i32) {
    %c0_i32 = arith.constant 0 : i32
    %c0_i32_0 = arith.constant 0 : i32
    %c0_i32_1 = arith.constant 0 : i32
    return %arg0, %c0_i32, %c0_i32_0 : i32, i32, i32
  }
}

</mosaic_0001>

<bundles_post_ra>
// kernel: tpu_custom_call.1
= control target key start
LH: loop header
LB: loop body
LE: loop exit
PB: predicated region body
PF: predicated region fallthrough
CT: control target
= control target key end

     0   :  { %vm53_vm0 = vcmask 130048   ;;  %s1683_s0 = inlined_call_operand.vmem [shape: f32[8,32,16], index: 0, kind: input, shape index: {}]   ;;  %s1684_s1 = inlined_call_operand.vmem [shape: f32[64,16], index: 1, kind: input, shape index: {}]   ;;  %s1685_s2 = inlined_call_operand.vmem [shape: f32[64,1], index: 2, kind: input, shape index: {}]   ;;  %s1686_s3 = inlined_call_operand.vmem [shape: f32[16,64], index: 3, kind: input, shape index: {}]   ;;  %s1687_s4 = inlined_call_operand.vmem [shape: f32[16,1], index: 4, kind: input, shape index: {}]   ;;  %s1688_s5 = inlined_call_operand.hbm [shape: f32[1,16,256], index: 5, kind: output, shape index: {}]  }
   0x1   :  { %v1047_v0 = vld [vmem:[%s1683_s0 + $0x18] sm:$0xff]  ;;  %v1078_v9 = vld [vmem:[%s1683_s0 + $0x10] sm:$0xff]  ;;  %v1123_v23 = vld [vmem:[%s1683_s0 + $0x8] sm:$0xff] }
   0x2   :  { %v1052_v1 = vld [vmem:[%s1683_s0 + $0x38] sm:$0xff]  ;;  %v99_v4 = vsel %vm53_vm0, %v1047_v0, 0.0  ;;  %v1085_v11 = vld [vmem:[%s1683_s0 + $0x30] sm:$0xff]  ;;  %v84_v14 = vsel %vm53_vm0, %v1078_v9, 0.0  ;;  %v1128_v24 = vld [vmem:[%s1683_s0 + $0x28] sm:$0xff]  ;;  %v69_v30 = vsel %vm53_vm0, %v1123_v23, 0.0 }
   0x3   :  { %v1057_v2 = vld [vmem:[%s1683_s0 + $0x58] sm:$0xff]  ;;  %v100_v5 = vsel %vm53_vm0, %v1052_v1, 0.0  ;;  %v1090_v12 = vld [vmem:[%s1683_s0 + $0x50] sm:$0xff]  ;;  %v85_v18 = vsel %vm53_vm0, %v1085_v11, 0.0  ;;  %v1140_v28 = vld [vmem:[%s1683_s0 + $0x48] sm:$0xff]  ;;  %v70_v31 = vsel %vm53_vm0, %v1128_v24, 0.0 }
   0x4   :  { %v1062_v3 = vld [vmem:[%s1683_s0 + $0x78] sm:$0xff]  ;;  %v102_v6 = vsel %vm53_vm0, %v1057_v2, 0.0  ;;  %v101_v8 = vadd.f32 %v100_v5, %v99_v4  ;;  %v1095_v13 = vld [vmem:[%s1683_s0 + $0x70] sm:$0xff]  ;;  %v87_v19 = vsel %vm53_vm0, %v1090_v12, 0.0  ;;  %v86_v22 = vadd.f32 %v85_v18, %v84_v14  ;;  %v1145_v29 = vld [vmem:[%s1683_s0 + $0x68] sm:$0xff] }
   0x5   :  { %v1073_v7 = vld [vmem:[%s1683_s0 + $0x98] sm:$0xff]  ;;  %v104_v10 = vsel %vm53_vm0, %v1062_v3, 0.0  ;;  %v1118_v21 = vld [vmem:[%s1683_s0 + $0x90] sm:$0xff]  ;;  %v89_v27 = vsel %vm53_vm0, %v1095_v13, 0.0  ;;  %v1159_v35 = vld [vmem:[%s1683_s0 + $0x88] sm:$0xff]  ;;  %v71_v36 = vadd.f32 %v70_v31, %v69_v30  ;;  %v72_v37 = vsel %vm53_vm0, %v1140_v28, 0.0 }
   0x6   :  { %v1102_v15 = vld [vmem:[%s1683_s0 + $0xb8] sm:$0xff]  ;;  %v103_v17 = vadd.f32 %v102_v6, %v101_v8  ;;  %v106_v20 = vsel %vm53_vm0, %v1073_v7, 0.0  ;;  %v1133_v26 = vld [vmem:[%s1683_s0 + $0xb0] sm:$0xff]  ;;  %v88_v34 = vadd.f32 %v87_v19, %v86_v22  ;;  %v91_v40 = vsel %vm53_vm0, %v1118_v21, 0.0  ;;  %v1172_v42 = vld [vmem:[%s1683_s0] sm:$0xff] }
   0x7   :  { %v1107_v16 = vld [vmem:[%s1683_s0 + $0xd8] sm:$0xff]  ;;  %v108_v33 = vsel %vm53_vm0, %v1102_v15, 0.0  ;;  %v74_v41 = vsel %vm53_vm0, %v1145_v29, 0.0  ;;  %v1177_v43 = vld [vmem:[%s1683_s0 + $0x20] sm:$0xff]  ;;  %v1187_v45 = vld [vmem:[%s1683_s0 + $0xd0] sm:$0xff]  ;;  %v93_v47 = vsel %vm53_vm0, %v1133_v26, 0.0  ;;  %v73_v48 = vadd.f32 %v72_v37, %v71_v36 }
   0x8   :  { %v105_v25 = vadd.f32 %v104_v10, %v103_v17  ;;  %v52_v32 = vld [vmem:[%s1683_s0 + $0xf8] sm:$0xff]  ;;  %v110_v39 = vsel %vm53_vm0, %v1107_v16, 0.0  ;;  %v1182_v44 = vld [vmem:[%s1683_s0 + $0x40] sm:$0xff]  ;;  %v90_v46 = vadd.f32 %v89_v27, %v88_v34  ;;  %v54_v49 = vsel %vm53_vm0, %v1172_v42, 0.0  ;;  %v1208_v57 = vld [vmem:[%s1683_s0 + $0xa8] sm:$0xff] }
   0x9   :  { %v76_v51 = vsel %vm53_vm0, %v1159_v35, 0.0  ;;  %v55_v52 = vsel %vm53_vm0, %v1177_v43, 0.0  ;;  %v57_v53 = vsel %vm53_vm0, %v1182_v44, 0.0  ;;  %v1202_v54 = vld [vmem:[%s1684_s1] sm:$0xff]  ;;  %v112_v55 = vsel %vm53_vm0, %v52_v32, 0.0 }
   0xa   :  { %v107_v38 = vadd.f32 %v106_v20, %v105_v25  ;;  %v92_v56 = vadd.f32 %v91_v40, %v90_v46  ;;  %v75_v58 = vadd.f32 %v74_v41, %v73_v48  ;;  %v1213_v59 = vld [vmem:[%s1683_s0 + $0x60] sm:$0xff]  ;;  %v56_v60 = vadd.f32 %v55_v52, %v54_v49  ;;  %908 = vmatprep.mubr.msk.f32.mxu0 %vm53_vm0, %v1202_v54 }
   0xc   :  { %v109_v50 = vadd.f32 %v108_v33, %v107_v38 }
   0xd   :  { %10 = vsyncpa [#allocation3], 0  ;;  %v95_v62 = vsel %vm53_vm0, %v1187_v45, 0.0  ;;  %v51_v63 = vld [vmem:[%s1683_s0 + $0xf0] sm:$0xff]  ;;  %v94_v4 = vadd.f32 %v93_v47, %v92_v56  ;;  %v77_v5 = vadd.f32 %v76_v51, %v75_v58  ;;  %v58_v6 = vadd.f32 %v57_v53, %v56_v60  ;;  %v1225_v10 = vld [vmem:[%s1683_s0 + $0xc8] sm:$0xff] }
   0xe   :  { %v111_v61 = vadd.f32 %v110_v39, %v109_v50  ;;  %v78_v14 = vsel %vm53_vm0, %v1208_v57, 0.0  ;;  %v59_v17 = vsel %vm53_vm0, %v1213_v59, 0.0  ;;  %v97_v20 = vsel %vm53_vm0, %v51_v63, 0.0  ;;  %v1249_v36 = vld [vmem:[%s1683_s0 + $0x80] sm:$0xff] }
   0xf   :  { %v96_v18 = vadd.f32 %v95_v62, %v94_v4  ;;  %v79_v22 = vadd.f32 %v78_v14, %v77_v5  ;;  %v80_v25 = vsel %vm53_vm0, %v1225_v10, 0.0  ;;  %v60_v27 = vadd.f32 %v59_v17, %v58_v6 }
  0x10   :  { %v113_v8 = vadd.f32 %v112_v55, %v111_v61  ;;  %v61_v46 = vsel %vm53_vm0, %v1249_v36, 0.0  ;;  %vm670_vm1 = vcmask 523264  }
  0x11   :  { %v98_v38 = vadd.f32 %v97_v20, %v96_v18  ;;  %v81_v55 = vadd.f32 %v80_v25, %v79_v22  ;;  %v62_v56 = vadd.f32 %v61_v46, %v60_v27  ;;  %v1333_v25 = vld [vmem:[%s1683_s0 + $0xc0] sm:$0xff] }
  0x12   :  { %v118_v19 = vmul.f32 0.125, %v113_v8 }
  0x13   :  { %v117_v53 = vmul.f32 0.125, %v98_v38 }
  0x14   :  { %v1235_v30 = vsub.f32 %v1047_v0, %v118_v19  ;;  %v1238_v31 = vsub.f32 %v1052_v1, %v118_v19  ;;  %v1241_v33 = vsub.f32 %v1057_v2, %v118_v19  ;;  %v1244_v34 = vsub.f32 %v1062_v3, %v118_v19 }
  0x15   :  { %v1252_v37 = vsub.f32 %v1073_v7, %v118_v19  ;;  %v1255_v0 = vsub.f32 %v1102_v15, %v118_v19  ;;  %v1258_v1 = vsub.f32 %v1107_v16, %v118_v19  ;;  %v1271_v15 = vld [vmem:[%s1683_s0 + $0xe8] sm:$0xff]  ;;  %v1273_v16 = vsub.f32 %v52_v32, %v118_v19 }
  0x16   :  { %v154_v2 = vmul.f32 %v1235_v30, %v1235_v30  ;;  %v158_v3 = vmul.f32 %v1238_v31, %v1238_v31  ;;  %v162_v39 = vmul.f32 %v1241_v33, %v1241_v33  ;;  %v166_v7 = vmul.f32 %v1244_v34, %v1244_v34 }
  0x17   :  { %v170_v40 = vmul.f32 %v1252_v37, %v1252_v37  ;;  %v174_v41 = vmul.f32 %v1255_v0, %v1255_v0  ;;  %v178_v50 = vmul.f32 %v1258_v1, %v1258_v1  ;;  %v82_v51 = vsel %vm53_vm0, %v1271_v15, 0.0 }
  0x18   :  { %v228_v47 = vsel %vm53_vm0, %v154_v2, 0.0  ;;  %v229_v48 = vsel %vm53_vm0, %v158_v3, 0.0  ;;  %v231_v49 = vsel %vm53_vm0, %v162_v39, 0.0  ;;  %v233_v52 = vsel %vm53_vm0, %v166_v7, 0.0 }
  0x19   :  { %v230_v32 = vadd.f32 %v229_v48, %v228_v47  ;;  %v182_v58 = vmul.f32 %v1273_v16, %v1273_v16  ;;  %v235_v61 = vsel %vm53_vm0, %v170_v40, 0.0  ;;  %v237_v62 = vsel %vm53_vm0, %v174_v41, 0.0  ;;  %v1345_v40 = vld [vmem:[%s1683_s0 + $0xe0] sm:$0xff] }
  0x1a   :  { %v1294_v4 = vsub.f32 %v1078_v9, %v117_v53  ;;  %v1297_v5 = vsub.f32 %v1085_v11, %v117_v53  ;;  %v1300_v6 = vsub.f32 %v1090_v12, %v117_v53  ;;  %v1303_v8 = vsub.f32 %v1095_v13, %v117_v53 }
  0x1b   :  { %v232_v60 = vadd.f32 %v231_v49, %v230_v32  ;;  %v239_v17 = vsel %vm53_vm0, %v178_v50, 0.0  ;;  %v1307_v18 = vsub.f32 %v1118_v21, %v117_v53  ;;  %v1310_v19 = vsub.f32 %v1133_v26, %v117_v53  ;;  %v1324_v21 = vld [vmem:[%s1683_s0 + $0xa0] sm:$0xff] }
  0x1c   :  { %v1313_v9 = vsub.f32 %v1187_v45, %v117_v53  ;;  %v153_v11 = vmul.f32 %v1294_v4, %v1294_v4  ;;  %v157_v12 = vmul.f32 %v1297_v5, %v1297_v5  ;;  %v161_v13 = vmul.f32 %v1300_v6, %v1300_v6 }
  0x1d   :  { %v234_v14 = vadd.f32 %v233_v52, %v232_v60  ;;  %v1326_v26 = vsub.f32 %v51_v63, %v117_v53  ;;  %v165_v45 = vmul.f32 %v1303_v8, %v1303_v8  ;;  %v83_v22 = vadd.f32 %v82_v51, %v81_v55 }
  0x1e   :  { %v169_v27 = vmul.f32 %v1307_v18, %v1307_v18  ;;  %v173_v38 = vmul.f32 %v1310_v19, %v1310_v19  ;;  %v213_v2 = vsel %vm53_vm0, %v153_v11, 0.0  ;;  %v214_v63 = vsel %vm53_vm0, %v157_v12, 0.0 }
  0x1f   :  { %v236_v20 = vadd.f32 %v235_v61, %v234_v14  ;;  %v215_v39 = vadd.f32 %v214_v63, %v213_v2  ;;  %v216_v7 = vsel %vm53_vm0, %v161_v13, 0.0  ;;  %v63_v41 = vsel %vm53_vm0, %v1324_v21, 0.0 }
  0x20   :  { %v241_v46 = vsel %vm53_vm0, %v182_v58, 0.0  ;;  %v177_v47 = vmul.f32 %v1313_v9, %v1313_v9  ;;  %v218_v48 = vsel %vm53_vm0, %v165_v45, 0.0  ;;  %v65_v49 = vsel %vm53_vm0, %v1333_v25, 0.0 }
  0x21   :  { %v238_v3 = vadd.f32 %v237_v62, %v236_v20  ;;  %v181_v32 = vmul.f32 %v1326_v26, %v1326_v26  ;;  %v217_v51 = vadd.f32 %v216_v7, %v215_v39  ;;  %v116_v52 = vmul.f32 0.125, %v83_v22 }
  0x22   :  { %v220_v53 = vsel %vm53_vm0, %v169_v27, 0.0  ;;  %v222_v55 = vsel %vm53_vm0, %v173_v38, 0.0  ;;  %v64_v60 = vadd.f32 %v63_v41, %v62_v56  ;;  %v67_v58 = vsel %vm53_vm0, %v1345_v40, 0.0 }
  0x23   :  { %v240_v50 = vadd.f32 %v239_v17, %v238_v3  ;;  %v219_v62 = vadd.f32 %v218_v48, %v217_v51  ;;  %v1362_v14 = vsub.f32 %v1123_v23, %v116_v52  ;;  %v1365_v17 = vsub.f32 %v1128_v24, %v116_v52  ;;  %v302_v51 = vld [vmem:[%s1685_s2 + $0x38] sm:$0xff] }
  0x24   :  { %v224_v11 = vsel %vm53_vm0, %v177_v47, 0.0  ;;  %v1369_v12 = vsub.f32 %v1140_v28, %v116_v52  ;;  %v1372_v13 = vsub.f32 %v1145_v29, %v116_v52  ;;  %v1375_v56 = vsub.f32 %v1159_v35, %v116_v52 }
  0x25   :  { %v242_v61 = vadd.f32 %v241_v46, %v240_v50  ;;  %v221_v45 = vadd.f32 %v220_v53, %v219_v62  ;;  %v226_v22 = vsel %vm53_vm0, %v181_v32, 0.0  ;;  %v1379_v23 = vsub.f32 %v1208_v57, %v116_v52  ;;  %v300_v32 = vld [vmem:[%s1685_s2 + $0x28] sm:$0xff] }
  0x26   :  { %v152_v24 = vmul.f32 %v1362_v14, %v1362_v14  ;;  %v156_v28 = vmul.f32 %v1365_v17, %v1365_v17  ;;  %v160_v29 = vmul.f32 %v1369_v12, %v1369_v12  ;;  %v164_v35 = vmul.f32 %v1372_v13, %v1372_v13 }
  0x27   :  { %v246_v20 = vmul.f32 0.125, %v242_v61  ;;  %v223_v38 = vadd.f32 %v222_v55, %v221_v45  ;;  %v1390_v2 = vsub.f32 %v1225_v10, %v116_v52  ;;  %v66_v63 = vadd.f32 %v65_v49, %v64_v60 }
  0x28   :  { %v1393_v57 = vsub.f32 %v1271_v15, %v116_v52  ;;  %v168_v3 = vmul.f32 %v1375_v56, %v1375_v56  ;;  %v198_v39 = vsel %vm53_vm0, %v152_v24, 0.0  ;;  %v199_v7 = vsel %vm53_vm0, %v156_v28, 0.0  ;;  %v299_v28 = vld [vmem:[%s1685_s2 + $0x20] sm:$0xff] }
  0x29   :  { %v250_v27 = vadd.f32 1e-05, %v246_v20  ;;  %v225_v41 = vadd.f32 %v224_v11, %v223_v38  ;;  %v200_v46 = vadd.f32 %v199_v7, %v198_v39  ;;  %v201_v47 = vsel %vm53_vm0, %v160_v29, 0.0 }
  0x2a   :  { %v172_v10 = vmul.f32 %v1379_v23, %v1379_v23  ;;  %v203_v48 = vsel %vm53_vm0, %v164_v35, 0.0  ;;  %v68_v50 = vadd.f32 %v67_v58, %v66_v63  ;;  %v176_v52 = vmul.f32 %v1390_v2, %v1390_v2 }
  0x2b   :  { %931 = vrsqrt.f32 %v250_v27  ;;  %v227_v49 = vadd.f32 %v226_v22, %v225_v41  ;;  %v202_v15 = vadd.f32 %v201_v47, %v200_v46  ;;  %v205_v53 = vsel %vm53_vm0, %v168_v3, 0.0 }
  0x2c   :  { %v180_v60 = vmul.f32 %v1393_v57, %v1393_v57  ;;  %v115_v62 = vmul.f32 0.125, %v68_v50  ;;  %v1009_v58 = vmov 0   ;;  %v207_v11 = vsel %vm53_vm0, %v172_v10, 0.0 }
  0x2d   :  { %v245_v55 = vmul.f32 0.125, %v227_v49  ;;  %v204_v61 = vadd.f32 %v203_v48, %v202_v15  ;;  %930 = vset.pattern.permute.xlu1 %v1009_v58  ;;  %929 = vset.pattern.permute.xlu0 %v1009_v58  ;;  %v209_v29 = vsel %vm53_vm0, %v176_v52, 0.0  ;;  %v298_v49 = vld [vmem:[%s1685_s2 + $0x18] sm:$0xff]  ;;  %v295_v58 = vld [vmem:[%s1685_s2] sm:$0xff] }
  0x2e   :  { %330 = vperm.xlu1 %930, %v300_v32   ;;  %340 = vperm.xlu0 %929, %v302_v51   ;;  %v1416_v22 = vsub.f32 %v1172_v42, %v115_v62  ;;  %v1419_v24 = vsub.f32 %v1177_v43, %v115_v62  ;;  %v1426_v35 = vsub.f32 %v1182_v44, %v115_v62  ;;  %v301_v42 = vld [vmem:[%s1685_s2 + $0x30] sm:$0xff]  ;;  %v211_v63 = vsel %vm53_vm0, %v180_v60, 0.0 }
  0x2f   :  { %v249_v20 = vadd.f32 1e-05, %v245_v55  ;;  %v206_v45 = vadd.f32 %v205_v53, %v204_v61  ;;  %v1429_v27 = vsub.f32 %v1213_v59, %v115_v62  ;;  %v1432_v38 = vsub.f32 %v1249_v36, %v115_v62 }
  0x30   :  { %v1439_v3 = vsub.f32 %v1324_v21, %v115_v62  ;;  %v151_v44 = vmul.f32 %v1416_v22, %v1416_v22  ;;  %v155_v59 = vmul.f32 %v1419_v24, %v1419_v24  ;;  %v159_v36 = vmul.f32 %v1426_v35, %v1426_v35  ;;  %v297_v21 = vld [vmem:[%s1685_s2 + $0x10] sm:$0xff] }
  0x31   :  { %933 = vrsqrt.f32 %v249_v20  ;;  %v208_v43 = vadd.f32 %v207_v11, %v206_v45  ;;  %v163_v39 = vmul.f32 %v1429_v27, %v1429_v27  ;;  %v1450_v41 = vsub.f32 %v1333_v25, %v115_v62 }
  0x32   :  { %325 = vperm.xlu1 %930, %v299_v28   ;;  %335 = vperm.xlu0 %929, %v301_v42   ;;  %v167_v46 = vmul.f32 %v1432_v38, %v1432_v38  ;;  %v183_v47 = vsel %vm53_vm0, %v151_v44, 0.0  ;;  %v184_v10 = vsel %vm53_vm0, %v155_v59, 0.0  ;;  %v186_v48 = vsel %vm53_vm0, %v159_v36, 0.0 }
  0x33   :  { %v210_v7 = vadd.f32 %v209_v29, %v208_v43  ;;  %v185_v15 = vadd.f32 %v184_v10, %v183_v47  ;;  %v147_v32 = vsub.f32 %v1345_v40, %v115_v62  ;;  %v171_v51 = vmul.f32 %v1439_v3, %v1439_v3  ;;  %v659_v43 = vld [vmem:[%s1687_s4 + $0x8] sm:$0xff] }
  0x34   :  { %v188_v52 = vsel %vm53_vm0, %v163_v39, 0.0  ;;  %v175_v40 = vmul.f32 %v1450_v41, %v1450_v41  ;;  %v190_v62 = vsel %vm53_vm0, %v167_v46, 0.0 }
  0x35   :  { %v212_v25 = vadd.f32 %v211_v63, %v210_v7  ;;  %v187_v61 = vadd.f32 %v186_v48, %v185_v15  ;;  %v192_v29 = vsel %vm53_vm0, %v171_v51, 0.0 }
  0x36   :  { %315 = vperm.xlu1 %930, %v297_v21   ;;  %320 = vperm.xlu0 %929, %v298_v49  }
  0x37   :  { %v244_v60 = vmul.f32 0.125, %v212_v25  ;;  %v189_v20 = vadd.f32 %v188_v52, %v187_v61 }
  0x38   :  { %v1463_v50 = vpop.eup %931 }
  0x39   :  { %v286_v53 = vmul.f32 %v1463_v50, %v1273_v16  ;;  %v270_v55 = vmul.f32 %v1463_v50, %v1244_v34  ;;  %v1481_v11 = vmul.f32 %v1463_v50, %v1238_v31  ;;  %v296_v34 = vld [vmem:[%s1685_s2 + $0x8] sm:$0xff]  ;;  %v248_v16 = vadd.f32 1e-05, %v244_v60 }
  0x3a   :  { %v1489_v45 = vmul.f32 %v1463_v50, %v1252_v37  ;;  %v1493_v28 = vmul.f32 %v1463_v50, %v1235_v30  ;;  %v179_v31 = vmul.f32 %v147_v32, %v147_v32  ;;  %305 = vperm.xlu1 %930, %v295_v58   ;;  %v191_v42 = vadd.f32 %v190_v62, %v189_v20  ;;  %v658_v30 = vld [vmem:[%s1687_s4] sm:$0xff] }
  0x3b   :  { %876 = vmatprep.subr.msk.mxu0 %vm53_vm0, %v286_v53  ;;  %935 = vrsqrt.f32 %v248_v16  ;;  %310 = vperm.xlu0 %929, %v296_v34   ;;  %v194_v37 = vsel %vm53_vm0, %v175_v40, 0.0  ;;  %v282_v52 = vmul.f32 %v1463_v50, %v1258_v1 }
  0x3c   :  { %877 = vmatpush3.xpose.msk.msra.mxu0 %vm53_vm0, %v270_v55  ;;  %v193_v63 = vadd.f32 %v192_v29, %v191_v42  ;;  %v196_v59 = vsel %vm53_vm0, %v179_v31, 0.0 }
  0x3e   :  { %v934_v44 = vpop.eup %933  ;;  %667 = vperm.xlu1 %930, %v659_v43   ;;  %v195_v7 = vadd.f32 %v194_v37, %v193_v63 }
  0x3f   :  { %v285_v36 = vmul.f32 %v934_v44, %v1326_v26  ;;  %v269_v39 = vmul.f32 %v934_v44, %v1303_v8  ;;  %662 = vperm.xlu0 %929, %v658_v30   ;;  %v273_v21 = vmul.f32 %v934_v44, %v1307_v18  ;;  %v257_v47 = vmul.f32 %v934_v44, %v1294_v4 }
  0x40   :  { %v197_v46 = vadd.f32 %v196_v59, %v195_v7 }
  0x41   :  { %878 = vmatprep.subr.msk.mxu0 %vm53_vm0, %v285_v36 }
  0x42   :  { %879 = vmatpush3.xpose.msk.msra.mxu0 %vm53_vm0, %v269_v39  ;;  %v243_v10 = vmul.f32 0.125, %v197_v46 }
  0x44   :  { %v247_v48 = vadd.f32 1e-05, %v243_v10 }
  0x46   :  { %937 = vrsqrt.f32 %v247_v48 }
  0x48   :  { %v936_v49 = vpop.eup %935 }
  0x49   :  { %v284_v25 = vmul.f32 %v936_v49, %v1393_v57  ;;  %v268_v26 = vmul.f32 %v936_v49, %v1372_v13  ;;  %v272_v8 = vmul.f32 %v936_v49, %v1375_v56  ;;  %v256_v15 = vmul.f32 %v936_v49, %v1362_v14 }
  0x4a   :  { %v266_v13 = vmul.f32 %v1463_v50, %v1241_v33  ;;  %v281_v14 = vmul.f32 %v934_v44, %v1313_v9  ;;  %v265_v56 = vmul.f32 %v934_v44, %v1300_v6  ;;  %v280_v57 = vmul.f32 %v936_v49, %v1390_v2 }
  0x4b   :  { %880 = vmatprep.subr.msk.mxu0 %vm53_vm0, %v284_v25  ;;  %v264_v1 = vmul.f32 %v936_v49, %v1369_v12  ;;  %v278_v6 = vmul.f32 %v1463_v50, %v1255_v0  ;;  %v277_v2 = vmul.f32 %v934_v44, %v1310_v19  ;;  %v261_v12 = vmul.f32 %v934_v44, %v1297_v5 }
  0x4c   :  { %881 = vmatpush3.xpose.msk.msra.mxu0 %vm53_vm0, %v268_v26  ;;  %v1010_v50 = vmov 0.0  }
  0x4d   :  { %741 = vmatprep.mubr.f32.mxu1 %v1010_v50 }
  0x53   :  { %v938_v18 = vpop.eup %937 }
  0x54   :  { %v283_v4 = vmul.f32 %v938_v18, %v147_v32  ;;  %v267_v51 = vmul.f32 %v938_v18, %v1429_v27  ;;  %v279_v33 = vmul.f32 %v938_v18, %v1450_v41  ;;  %v263_v9 = vmul.f32 %v938_v18, %v1426_v35  ;;  %v294_v41 = vld [vmem:[%s1684_s1 + $0x38] sm:$0xff] }
  0x55   :  { %v276_v35 = vmul.f32 %v936_v49, %v1379_v23  ;;  %v260_v27 = vmul.f32 %v936_v49, %v1365_v17  ;;  %v275_v0 = vmul.f32 %v938_v18, %v1439_v3  ;;  %v259_v19 = vmul.f32 %v938_v18, %v1419_v24  ;;  %v288_v23 = vld [vmem:[%s1684_s1 + $0x8] sm:$0xff]  ;;  %v289_v24 = vld [vmem:[%s1684_s1 + $0x10] sm:$0xff] }
  0x56   :  { %882 = vmatprep.subr.msk.mxu0 %vm53_vm0, %v283_v4  ;;  %v271_v5 = vmul.f32 %v938_v18, %v1432_v38  ;;  %v255_v17 = vmul.f32 %v938_v18, %v1416_v22  ;;  %v290_v22 = vld [vmem:[%s1684_s1 + $0x18] sm:$0xff]  ;;  %v292_v38 = vld [vmem:[%s1684_s1 + $0x28] sm:$0xff]  ;;  %v293_v3 = vld [vmem:[%s1684_s1 + $0x30] sm:$0xff] }
  0x57   :  { %883 = vmatpush3.xpose.msk.msra.mxu0 %vm53_vm0, %v267_v51 }
  0x58   :  { %884 = vmatprep.subr.msk.mxu0 %vm53_vm0, %v282_v52 }
  0x5b   :  { %885 = vmatpush3.xpose.msk.msra.mxu0 %vm53_vm0, %v266_v13 }
  0x5c   :  { %886 = vmatprep.subr.msk.mxu0 %vm53_vm0, %v281_v14 }
  0x5f   :  { %887 = vmatpush3.xpose.msk.msra.mxu0 %vm53_vm0, %v265_v56 }
  0x60   :  { %888 = vmatprep.subr.msk.mxu0 %vm53_vm0, %v280_v57 }
  0x63   :  { %889 = vmatpush3.xpose.msk.msra.mxu0 %vm53_vm0, %v264_v1 }
  0x64   :  { %890 = vmatprep.subr.msk.mxu0 %vm53_vm0, %v279_v33 }
  0x67   :  { %891 = vmatpush3.xpose.msk.msra.mxu0 %vm53_vm0, %v263_v9 }
  0x68   :  { %892 = vmatprep.subr.msk.mxu0 %vm53_vm0, %v278_v6 }
  0x6b   :  { %893 = vmatpush3.xpose.msk.msra.mxu0 %vm53_vm0, %v1481_v11 }
  0x6c   :  { %894 = vmatprep.subr.msk.mxu0 %vm53_vm0, %v277_v2 }
  0x6f   :  { %895 = vmatpush3.xpose.msk.msra.mxu0 %vm53_vm0, %v261_v12 }
  0x70   :  { %896 = vmatprep.subr.msk.mxu0 %vm53_vm0, %v276_v35 }
  0x73   :  { %897 = vmatpush3.xpose.msk.msra.mxu0 %vm53_vm0, %v260_v27 }
  0x74   :  { %898 = vmatprep.subr.msk.mxu0 %vm53_vm0, %v275_v0 }
  0x77   :  { %899 = vmatpush3.xpose.msk.msra.mxu0 %vm53_vm0, %v259_v19 }
  0x78   :  { %900 = vmatprep.subr.msk.mxu0 %vm53_vm0, %v1489_v45 }
  0x7b   :  { %901 = vmatpush3.xpose.msk.msra.mxu0 %vm53_vm0, %v1493_v28 }
  0x7c   :  { %902 = vmatprep.subr.msk.mxu0 %vm53_vm0, %v273_v21 }
  0x7f   :  { %903 = vmatpush3.xpose.msk.msra.mxu0 %vm53_vm0, %v257_v47 }
  0x80   :  { %904 = vmatprep.subr.msk.mxu0 %vm53_vm0, %v272_v8 }
  0x83   :  { %905 = vmatpush3.xpose.msk.msra.mxu0 %vm53_vm0, %v256_v15 }
  0x84   :  { %906 = vmatprep.subr.msk.mxu0 %vm53_vm0, %v271_v5 }
  0x87   :  { %907 = vmatpush3.xpose.msk.msra.mxu0 %vm53_vm0, %v255_v17 }
  0x8a   :  { %909 = vmatmul.mubr.msk.f32.vlgmr.msra.gmra.mxu0 %vm53_vm0, %v1202_v54  ;;  %v291_v54 = vld [vmem:[%s1684_s1 + $0x20] sm:$0xff] }
  0x8b   :  { %910 = vmatprep.mubr.msk.f32.mxu0 %vm53_vm0, %v288_v23 }
  0x8e   :  { %911 = vmatmul.mubr.msk.f32.gmra.mxu0 %vm53_vm0, %v288_v23 }
  0x8f   :  { %912 = vmatprep.mubr.msk.f32.mxu0 %vm53_vm0, %v289_v24 }
  0x92   :  { %913 = vmatmul.mubr.msk.f32.gmra.mxu0 %vm53_vm0, %v289_v24 }
  0x93   :  { %914 = vmatprep.mubr.msk.f32.mxu0 %vm53_vm0, %v290_v22 }
  0x96   :  { %915 = vmatmul.mubr.msk.f32.gmra.mxu0 %vm53_vm0, %v290_v22 }
  0x97   :  { %916 = vmatprep.mubr.msk.f32.mxu0 %vm53_vm0, %v291_v54 }
  0x9a   :  { %917 = vmatmul.mubr.msk.f32.gmra.mxu0 %vm53_vm0, %v291_v54 }
  0x9b   :  { %918 = vmatprep.mubr.msk.f32.mxu0 %vm53_vm0, %v292_v38 }
  0x9e   :  { %919 = vmatmul.mubr.msk.f32.gmra.mxu0 %vm53_vm0, %v292_v38 }
  0x9f   :  { %920 = vmatprep.mubr.msk.f32.mxu0 %vm53_vm0, %v293_v3 }
  0xa2   :  { %921 = vmatmul.mubr.msk.f32.gmra.mxu0 %vm53_vm0, %v293_v3 }
  0xa3   :  { %922 = vmatprep.mubr.msk.f32.mxu0 %vm53_vm0, %v294_v41 }
  0xa6   :  { %923 = vmatmul.mubr.msk.f32.gmra.mxu0 %vm53_vm0, %v294_v41 }
  0xa9   :  { %v341_v11 = vpop.permute.xlu0 %340  ;;  %v331_v16 = vpop.permute.xlu1 %330 }
  0xad   :  { %v336_v28 = vpop.permute.xlu0 %335  ;;  %v326_v29 = vpop.permute.xlu1 %325 }
  0xb1   :  { %v321_v63 = vpop.permute.xlu0 %320  ;;  %v316_v7 = vpop.permute.xlu1 %315 }
  0xb5   :  { %v306_v57 = vpop.permute.xlu1 %305 }
  0xb6   :  { %v311_v4 = vpop.permute.xlu0 %310 }
 0x14a   :  { %v529_v32 = vpop.f32.mrf.mxu0 }
 0x14b   :  { %v1640_v35 = vadd.f32 %v529_v32, %v306_v57 }
 0x14c   :  { %v531_v53 = vpop.f32.mrf.mxu0 }
 0x14d   :  { %v1637_v2 = vadd.f32 %v531_v53, %v306_v57  ;;  %v592_v17 = vmul.f32 0.70710677, %v1640_v35 }
 0x14e   :  { %v535_v55 = vpop.f32.mrf.mxu0 }
 0x14f   :  { %v1634_v9 = vadd.f32 %v535_v55, %v311_v4  ;;  %v593_v5 = vmul.f32 0.70710677, %v1637_v2 }
 0x150   :  { %v537_v60 = vpop.f32.mrf.mxu0 }
 0x151   :  { %v1631_v1 = vadd.f32 %v537_v60, %v311_v4  ;;  %v594_v19 = vmul.f32 0.70710677, %v1634_v9 }
 0x152   :  { %v541_v61 = vpop.f32.mrf.mxu0 }
 0x153   :  { %v1628_v14 = vadd.f32 %v541_v61, %v316_v7  ;;  %v595_v0 = vmul.f32 0.70710677, %v1631_v1 }
 0x154   :  { %v543_v58 = vpop.f32.mrf.mxu0 }
 0x155   :  { %v1625_v51 = vadd.f32 %v543_v58, %v316_v7  ;;  %v596_v27 = vmul.f32 0.70710677, %v1628_v14 }
 0x156   :  { %v547_v40 = vpop.f32.mrf.mxu0 }
 0x157   :  { %v1622_v15 = vadd.f32 %v547_v40, %v321_v63  ;;  %v597_v12 = vmul.f32 0.70710677, %v1625_v51 }
 0x158   :  { %v549_v62 = vpop.f32.mrf.mxu0 }
 0x159   :  { %v1620_v25 = vadd.f32 %v549_v62, %v321_v63  ;;  %v598_v6 = vmul.f32 0.70710677, %v1622_v15 }
 0x15a   :  { %v553_v34 = vpop.f32.mrf.mxu0 }
 0x15b   :  { %v1617_v10 = vadd.f32 %v553_v34, %v326_v29  ;;  %v599_v33 = vmul.f32 0.70710677, %v1620_v25 }
 0x15c   :  { %v555_v20 = vpop.f32.mrf.mxu0 }
 0x15d   :  { %v1614_v21 = vadd.f32 %v555_v20, %v326_v29  ;;  %v600_v56 = vmul.f32 0.70710677, %v1617_v10 }
 0x15e   :  { %v559_v45 = vpop.f32.mrf.mxu0 }
 0x15f   :  { %v1612_v36 = vadd.f32 %v559_v45, %v331_v16  ;;  %v601_v52 = vmul.f32 0.70710677, %v1614_v21 }
 0x160   :  { %v561_v31 = vpop.f32.mrf.mxu0 }
 0x161   :  { %v1605_v42 = vadd.f32 %v561_v31, %v331_v16  ;;  %v602_v18 = vmul.f32 0.70710677, %v1612_v36 }
 0x162   :  { %v565_v43 = vpop.f32.mrf.mxu0 }
 0x163   :  { %v1607_v37 = vadd.f32 %v565_v43, %v336_v28  ;;  %v603_v44 = vmul.f32 0.70710677, %v1605_v42  ;;  %v587_v29 = vmul.f32 0.5, %v1605_v42 }
 0x164   :  { %v567_v30 = vpop.f32.mrf.mxu0 }
 0x165   :  { %v1610_v59 = vadd.f32 %v567_v30, %v336_v28  ;;  %v604_v48 = vmul.f32 0.70710677, %v1607_v37  ;;  %939 = verf.f32 %v603_v44  ;;  %v588_v20 = vmul.f32 0.5, %v1607_v37 }
 0x166   :  { %v571_v39 = vpop.f32.mrf.mxu0  ;;  %v586_v44 = vmul.f32 0.5, %v1612_v36 }
 0x167   :  { %v605_v46 = vmul.f32 0.70710677, %v1610_v59  ;;  %v572_v47 = vadd.f32 %v571_v39, %v341_v11  ;;  %v589_v62 = vmul.f32 0.5, %v1610_v59 }
 0x168   :  { %v573_v49 = vpop.f32.mrf.mxu0 }
 0x169   :  { %v606_v26 = vmul.f32 0.70710677, %v572_v47  ;;  %v574_v8 = vadd.f32 %v573_v49, %v341_v11  ;;  %941 = verf.f32 %v605_v46  ;;  %v590_v61 = vmul.f32 0.5, %v572_v47 }
 0x16a   :  { %v585_v46 = vmul.f32 0.5, %v1614_v21  ;;  %v584_v49 = vmul.f32 0.5, %v1617_v10 }
 0x16b   :  { %943 = verf.f32 %v606_v26  ;;  %v607_v13 = vmul.f32 0.70710677, %v574_v8  ;;  %v591_v32 = vmul.f32 0.5, %v574_v8 }
 0x16c   :  { %945 = verf.f32 %v604_v48 }
 0x16d   :  { %947 = verf.f32 %v607_v13  ;;  %v582_v13 = vmul.f32 0.5, %v1622_v15  ;;  %v578_v15 = vmul.f32 0.5, %v1634_v9  ;;  %v657_v9 = vld [vmem:[%s1686_s3 + $0x8] sm:$0xff] }
 0x16e   :  { %949 = verf.f32 %v602_v18  ;;  %v583_v18 = vmul.f32 0.5, %v1620_v25 }
 0x16f   :  { %951 = verf.f32 %v601_v52 }
 0x170   :  { %953 = verf.f32 %v600_v56 }
 0x171   :  { %955 = verf.f32 %v599_v33  ;;  %v581_v33 = vmul.f32 0.5, %v1625_v51  ;;  %v577_v51 = vmul.f32 0.5, %v1637_v2  ;;  %v663_v2 = vpop.permute.xlu0 %662 }
 0x172   :  { %957 = verf.f32 %v598_v6  ;;  %v940_v23 = vpop.eup %939 }
 0x173   :  { %959 = verf.f32 %v597_v12  ;;  %v635_v34 = vadd.f32 1.0, %v940_v23  ;;  %v580_v12 = vmul.f32 0.5, %v1628_v14 }
 0x174   :  { %961 = verf.f32 %v596_v27 }
 0x175   :  { %963 = verf.f32 %v595_v0  ;;  %v651_v47 = vmul.f32 %v635_v34, %v587_v29  ;;  %v579_v0 = vmul.f32 0.5, %v1631_v1 }
 0x176   :  { %965 = verf.f32 %v594_v19  ;;  %v942_v24 = vpop.eup %941 }
 0x177   :  { %967 = verf.f32 %v593_v5  ;;  %v637_v55 = vadd.f32 1.0, %v942_v24 }
 0x178   :  { %v944_v22 = vpop.eup %943  ;;  %969 = verf.f32 %v592_v17 }
 0x179   :  { %v946_v54 = vpop.eup %945  ;;  %v638_v3 = vadd.f32 1.0, %v944_v22  ;;  %v653_v43 = vmul.f32 %v637_v55, %v589_v62  ;;  %v576_v22 = vmul.f32 0.5, %v1640_v35  ;;  %v668_v55 = vpop.permute.xlu1 %667 }
 0x17a   :  { %v948_v38 = vpop.eup %947  ;;  %v636_v58 = vadd.f32 1.0, %v946_v54 }
 0x17b   :  { %v950_v41 = vpop.eup %949  ;;  %v639_v53 = vadd.f32 1.0, %v948_v38  ;;  %v654_v45 = vmul.f32 %v638_v3, %v590_v61  ;;  %v656_v38 = vld [vmem:[%s1686_s3] sm:$0xff]  ;;  %s1011_s3 = smov [#allocation2]  }
 0x17c   :  { %v952_v60 = vpop.eup %951  ;;  %v634_v28 = vadd.f32 1.0, %v950_v41  ;;  %v652_v39 = vmul.f32 %v636_v58, %v588_v20  ;;  %s823_s17 = sshll.u32 %s1011_s3, 4  ;;  %s824_s17 = int_to_ptr.vmem [resolvable:$true] %s823_s17 }
 0x17d   :  { %v954_v40 = vpop.eup %953  ;;  %v655_v11 = vmul.f32 %v639_v53, %v591_v32  ;;  %v633_v30 = vadd.f32 1.0, %v952_v60  ;;  %s987_s18 = scalar_lea.vmem %s824_s17, 512  ;;  %p992_p1 = scmp.lt.s32.totalorder %s824_s17, %s824_s17 }
 0x17e   :  { %v956_v16 = vpop.eup %955  ;;  %v632_v7 = vadd.f32 1.0, %v954_v40  ;;  %v650_v42 = vmul.f32 %v634_v28, %v586_v44  ;;  %p988_p0 = scmp.ne.s32.totalorder %s824_s17, %s987_s18  ;;  %p993_p2 = scmp.lt.s32.totalorder %s987_s18, %s987_s18 }
 0x17f   :  { %v958_v31 = vpop.eup %957  ;;  %693 = vmatprep.subr.mxu1 %v655_v11  ;;  %v631_v37 = vadd.f32 1.0, %v956_v16  ;;  %v649_v36 = vmul.f32 %v633_v30, %v585_v46 }
 0x180   :  { %v960_v63 = vpop.eup %959  ;;  %694 = vmatpush1.msra.mxu1 %v654_v45  ;;  %v630_v26 = vadd.f32 1.0, %v958_v31  ;;  %v648_v21 = vmul.f32 %v632_v7, %v584_v49  ;;  %p994_p3 = por %p993_p2, %p992_p1 }
 0x181   :  { %v962_v59 = vpop.eup %961  ;;  %695 = vmatprep.subr.mxu1 %v653_v43  ;;  %v629_v4 = vadd.f32 1.0, %v960_v63  ;;  %v647_v10 = vmul.f32 %v631_v37, %v583_v18 }
 0x182   :  { %v964_v48 = vpop.eup %963  ;;  %696 = vmatpush1.msra.mxu1 %v652_v39  ;;  %v628_v56 = vadd.f32 1.0, %v962_v59  ;;  %v646_v27 = vmul.f32 %v630_v26, %v582_v13  ;;  %p995_p4 = pnand %p994_p3, %p988_p0 }
 0x183   :  { %v966_v8 = vpop.eup %965  ;;  %697 = vmatprep.subr.mxu1 %v651_v47  ;;  %v627_v6 = vadd.f32 1.0, %v964_v48  ;;  %v645_v19 = vmul.f32 %v629_v4, %v581_v33 }
 0x184   :  { %v968_v52 = vpop.eup %967  ;;  %698 = vmatpush1.msra.mxu1 %v650_v42  ;;  %v626_v25 = vadd.f32 1.0, %v966_v8  ;;  %v644_v17 = vmul.f32 %v628_v56, %v580_v12 }
 0x185   :  { %v970_v57 = vpop.eup %969  ;;  %699 = vmatprep.subr.mxu1 %v649_v36  ;;  %v625_v5 = vadd.f32 1.0, %v968_v52  ;;  %v643_v24 = vmul.f32 %v627_v6, %v579_v0 }
 0x186   :  { %700 = vmatpush1.msra.mxu1 %v648_v21  ;;  %v624_v23 = vadd.f32 1.0, %v970_v57  ;;  %v642_v14 = vmul.f32 %v626_v25, %v578_v15 }
 0x187   :  { %701 = vmatprep.subr.mxu1 %v647_v10  ;;  %v641_v54 = vmul.f32 %v625_v5, %v577_v51 }
 0x188   :  { %702 = vmatpush1.msra.mxu1 %v646_v27  ;;  %v640_v1 = vmul.f32 %v624_v23, %v576_v22 }
 0x189   :  { %703 = vmatprep.subr.mxu1 %v645_v19 }
 0x18a   :  { %704 = vmatpush1.msra.mxu1 %v644_v17 }
 0x18b   :  { %705 = vmatprep.subr.mxu1 %v643_v24 }
 0x18c   :  { %706 = vmatpush1.msra.mxu1 %v642_v14 }
 0x18d   :  { %707 = vmatprep.subr.mxu1 %v641_v54 }
 0x18e   :  { %708 = vmatpush1.msra.mxu1 %v640_v1 }
 0x18f   :  { %874 = vmatmul.mubr.msk.f32.vlgmr.msra.gmra.mxu1 %vm670_vm1, %v656_v38 }
 0x190   :  { %747 = vmatprep.mubr.f32.mxu1 %v1010_v50 }
 0x193   :  { %875 = vmatmul.mubr.msk.f32.gmra.mxu1 %vm670_vm1, %v657_v9 }
 0x24f   :  { %v743_v35 = vpop.f32.mrf.mxu1 }
 0x250   :  { %v744_v3 = vadd.f32 %v743_v35, %v663_v2 }
 0x251   :  { %v745_v41 = vpop.f32.mrf.mxu1 }
 0x252   :  { %v758_v32 = vand.u32 2147483647, %v744_v3  ;;  %v1668_v53 = vadd.f32 %v745_v41, %v663_v2  ;;  %v754_v57 = vmax.f32 %v744_v3, 0.0 }
 0x253   :  { %v749_v60 = vpop.f32.mrf.mxu1 }
 0x254   :  { %v762_v61 = vsub.f32 0.0, %v758_v32  ;;  %v759_v58 = vand.u32 2147483647, %v1668_v53  ;;  %v1671_v40 = vadd.f32 %v749_v60, %v668_v55  ;;  %v755_v0 = vmax.f32 %v1668_v53, 0.0 }
 0x255   :  { %v751_v50 = vpop.f32.mrf.mxu1 }
 0x256   :  { %v766_v62 = vmul.f32 1.442695, %v762_v61  ;;  %v763_v11 = vsub.f32 0.0, %v759_v58  ;;  %v760_v34 = vand.u32 2147483647, %v1671_v40  ;;  %v1674_v16 = vadd.f32 %v751_v50, %v668_v55 }
 0x257   :  { %v756_v24 = vmax.f32 %v1671_v40, 0.0 }
 0x258   :  { %971 = vpow2.f32 %v766_v62  ;;  %v768_v20 = vmul.f32 1.442695, %v763_v11  ;;  %v764_v45 = vsub.f32 0.0, %v760_v34  ;;  %v761_v28 = vand.u32 2147483647, %v1674_v16 }
 0x259   :  { %v757_v9 = vmax.f32 %v1674_v16, 0.0 }
 0x25a   :  { %973 = vpow2.f32 %v768_v20  ;;  %v770_v31 = vmul.f32 1.442695, %v764_v45  ;;  %v765_v29 = vsub.f32 0.0, %v761_v28 }
 0x25c   :  { %975 = vpow2.f32 %v770_v31  ;;  %v772_v43 = vmul.f32 1.442695, %v765_v29 }
 0x25e   :  { %977 = vpow2.f32 %v772_v43 }
 0x265   :  { %v972_v30 = vpop.eup %971 }
 0x266   :  { %v774_v63 = vadd.f32 1.0, %v972_v30  ;;  %v777_v37 = vmul.f32 -0.5, %v972_v30  ;;  %v780_v26 = vand.u32 2147483647, %v972_v30 }
 0x267   :  { %v974_v44 = vpop.eup %973 }
 0x268   :  { %979 = vlog2.f32 %v774_v63  ;;  %v783_v39 = vadd.f32 1.0, %v974_v44  ;;  %v786_v48 = vmul.f32 -0.5, %v974_v44  ;;  %v778_v49 = vadd.f32 1.0, %v777_v37 }
 0x269   :  { %v976_v7 = vpop.eup %975  ;;  %v789_v36 = vand.u32 2147483647, %v974_v44  ;;  %vm781_vm2 = vcmp.lt.f32.partialorder %v780_v26, 0.0004427343 }
 0x26a   :  { %981 = vlog2.f32 %v783_v39  ;;  %v792_v59 = vadd.f32 1.0, %v976_v7  ;;  %v795_v42 = vmul.f32 -0.5, %v976_v7  ;;  %v787_v8 = vadd.f32 1.0, %v786_v48 }
 0x26b   :  { %v978_v46 = vpop.eup %977  ;;  %v779_v13 = vmul.f32 %v972_v30, %v778_v49  ;;  %v798_v33 = vand.u32 2147483647, %v976_v7  ;;  %vm790_vm3 = vcmp.lt.f32.partialorder %v789_v36, 0.0004427343 }
 0x26c   :  { %983 = vlog2.f32 %v792_v59  ;;  %v801_v47 = vadd.f32 1.0, %v978_v46  ;;  %v804_v4 = vmul.f32 -0.5, %v978_v46  ;;  %v796_v21 = vadd.f32 1.0, %v795_v42 }
 0x26d   :  { %v788_v12 = vmul.f32 %v974_v44, %v787_v8  ;;  %v807_v23 = vand.u32 2147483647, %v978_v46  ;;  %vm799_vm4 = vcmp.lt.f32.partialorder %v798_v33, 0.0004427343 }
 0x26e   :  { %985 = vlog2.f32 %v801_v47  ;;  %v805_v19 = vadd.f32 1.0, %v804_v4  ;;  %v797_v17 = vmul.f32 %v976_v7, %v796_v21 }
 0x26f   :  { %vm808_vm5 = vcmp.lt.f32.partialorder %v807_v23, 0.0004427343 }
 0x270   :  { %v806_v38 = vmul.f32 %v978_v46, %v805_v19 }
 0x275   :  { %v980_v18 = vpop.eup %979 }
 0x276   :  { %v776_v52 = vmul.f32 0.6931472, %v980_v18 }
 0x277   :  { %v982_v56 = vpop.eup %981 }
 0x278   :  { %v782_v10 = vsel %vm781_vm2, %v779_v13, %v776_v52  ;;  %v785_v6 = vmul.f32 0.6931472, %v982_v56 }
 0x279   :  { %v984_v27 = vpop.eup %983  ;;  %v810_v25 = vadd.f32 %v782_v10, %v754_v57 }
 0x27a   :  { %v791_v5 = vsel %vm790_vm3, %v788_v12, %v785_v6  ;;  %v794_v15 = vmul.f32 0.6931472, %v984_v27 }
 0x27b   :  { %814 = vst [vmem:[#allocation2] sm:$0xff] %v810_v25  ;;  %v811_v51 = vadd.f32 %v791_v5, %v755_v0  ;;  %v986_v22 = vpop.eup %985 }
 0x27c   :  { %v800_v14 = vsel %vm799_vm4, %v797_v17, %v794_v15  ;;  %v803_v1 = vmul.f32 0.6931472, %v986_v22 }
 0x27d   :  { %815 = vst [vmem:[#allocation2 + $0x8] sm:$0xff] %v811_v51  ;;  %v812_v54 = vadd.f32 %v800_v14, %v756_v24 }
 0x27e   :  { %v809_v2 = vsel %vm808_vm5, %v806_v38, %v803_v1 }
 0x27f   :  { %816 = vst [vmem:[#allocation2 + $0x10] sm:$0xff] %v812_v54  ;;  %v813_v35 = vadd.f32 %v809_v2, %v757_v9 }
 0x281   :  { %817 = vst [vmem:[#allocation2 + $0x18] sm:$0xff] %v813_v35 }
 0x282   :  { %998 = shalt.err (!%p995_p4)
}
 0x283   :  { %s1012_s19 = smov 256   ;;  %s1013_s20 = smov 16  }
 0x284   :  { %829 = dma.vmem_to_hbm [thread:$0]  %s824_s17, 512, %s1688_s5, [#allocation3], %s1012_s19, %s1012_s19, %s1013_s20  }
 0x285   :  { %1007 = dma.done.wait [#allocation3], 512  }
 0x286   :  { %1008 = vsyncadd [#allocation3], 4294966784 }
 0x287   :  { %833 = vsyncpa [#allocation3], 1 }

</bundles_post_ra>
